<compile_context>
chip_gen: v6e
topology: v6e:2x2x1
jax: 0.10.0
libtpu: 0.0.40
codegen_flags: <defaults>
</compile_context>

<pallas_src>
import functools

import jax
import jax.numpy as jnp
from jax.experimental import pallas as pl
from jax.experimental.pallas import tpu as pltpu

_LANE = 128
_SUBLANE = 8
_TARGET_STEP_BYTES = 4 * 1024 * 1024   # ~4 MiB of in+out HBM traffic per step


# --------------------------------------------------------------------------
# Kernels
# --------------------------------------------------------------------------
def _pair_trans_kernel(z_ref, w1_ref, b1_ref, w2_ref, b2_ref, out_ref,
                       *, eps, mxu_dtype):
    """Straightforward path: one logical row per block row (z_dim lanes)."""
    z = z_ref[...].astype(jnp.float32)                       # (tm, z_dim)

    # LayerNorm (biased variance, eps inside rsqrt); affine folded into W1/b1.
    mean = jnp.mean(z, axis=-1, keepdims=True)
    centered = z - mean
    var = jnp.mean(centered * centered, axis=-1, keepdims=True)
    zn = centered * jax.lax.rsqrt(var + eps)

    h = jnp.dot(zn.astype(mxu_dtype), w1_ref[...],
                preferred_element_type=jnp.float32)
    h = jnp.maximum(h + b1_ref[...], 0.0)                    # (tm, hidden)

    o = jnp.dot(h.astype(mxu_dtype), w2_ref[...],
                preferred_element_type=jnp.float32)
    out_ref[...] = (o + b2_ref[...]).astype(out_ref.dtype)


def _pair_trans_packed_kernel(z_ref, stat_ref, w1_ref, b1_ref, w2_ref, b2_ref,
                              out_ref, *, eps, mxu_dtype):
    """Lane-dense path for z_dim < 128: P=128//z_dim logical rows per row.

    stat_ref : (128, 128) block-diagonal matrix with 1/z_dim blocks, so
               z @ stat broadcasts each group's mean to all lanes of the group.
    w1_ref   : (128, P*hidden)  block-diagonal (LN affine already folded in).
    w2_ref   : (P*hidden, 128)  block-diagonal.
    """
    z = z_ref[...].astype(jnp.float32)                       # (tm_p, 128)
    stat = stat_ref[...]

    # Segmented (per-group) LayerNorm statistics via MXU matmuls.
    mean = jnp.dot(z, stat, preferred_element_type=jnp.float32)
    centered = z - mean
    var = jnp.dot(centered * centered, stat, preferred_element_type=jnp.float32)
    zn = centered * jax.lax.rsqrt(var + eps)

    h = jnp.dot(zn.astype(mxu_dtype), w1_ref[...],
                preferred_element_type=jnp.float32)
    h = jnp.maximum(h + b1_ref[...], 0.0)                    # (tm_p, P*hidden)

    o = jnp.dot(h.astype(mxu_dtype), w2_ref[...],
                preferred_element_type=jnp.float32)
    out_ref[...] = (o + b2_ref[...]).astype(out_ref.dtype)   # (tm_p, 128)


# --------------------------------------------------------------------------
# Sizing helpers (VMEM accounting uses the real (8,128)-tiled footprint)
# --------------------------------------------------------------------------
def _round_up(x, m):
    return ((x + m - 1) // m) * m


def _padded_bytes(rows, cols, itemsize=4):
    return _round_up(max(rows, 1), _SUBLANE) * _round_up(max(cols, 1), _LANE) * itemsize


def _kernel_vmem_bytes(tm, in_cols, hid_cols, out_cols, weight_shapes):
    # Streamed in/out blocks: double-buffered by the pipeline.
    b = 2 * _padded_bytes(tm, in_cols) + 2 * _padded_bytes(tm, out_cols)
    # Weight/bias blocks: constant index_map but still allocated with two
    # buffers by the default pipeline -> count both copies.
    for (r, c) in weight_shapes:
        b += 2 * _padded_bytes(r, c)
    # f32 intermediates (zn and the hidden activation) that spill at large tm.
    b += _padded_bytes(tm, in_cols) + _padded_bytes(tm, hid_cols)
    return b


def _vmem_budget_bytes():
    cap = None
    try:
        cap = int(getattr(pltpu.get_tpu_info(), "vmem_capacity_bytes", 0)) or None
    except Exception:
        cap = None
    if cap is None:
        cap = 64 * 1024 * 1024                     # conservative (v7x-sized)
    if cap <= 64 * 1024 * 1024:                    # v7x: 64 MiB per TensorCore
        return 52 * 1024 * 1024                    # leave Mosaic scratch headroom
    # v5e / v6e: 128 MiB physical VMEM.
    return min(cap - 24 * 1024 * 1024, 104 * 1024 * 1024)


def _vmem_limit(need, budget):
    # Headroom over the estimate, never above the per-generation budget.
    return int(min(max(2 * need, 32 * 1024 * 1024),
                   max(budget, need + 4 * 1024 * 1024)))


def _num_tensorcores():
    try:
        info = pltpu.get_tpu_info()
        for name in ("num_cores", "core_count", "num_tensorcores"):
            v = getattr(info, name, None)
            if isinstance(v, int) and v > 0:
                return v
    except Exception:
        pass
    try:
        v = getattr(jax.devices()[0], "num_cores", None)
        if isinstance(v, int) and v > 0:
            return v
    except Exception:
        pass
    return 1


def _choose_tile_rows(n_rows, in_cols, hid_cols, out_cols, weight_shapes,
                      vmem_budget, n_cores, requested_tm=None):
    """Pick (tile_rows, grid_len): byte-targeted, VMEM-safe, no pad needed."""
    if requested_tm is None:
        per_row_io = (in_cols + out_cols) * 4
        tm = max(_SUBLANE, _TARGET_STEP_BYTES // per_row_io)
        while tm > _SUBLANE and _kernel_vmem_bytes(
                tm, in_cols, hid_cols, out_cols, weight_shapes) > vmem_budget:
            tm //= 2
    else:
        tm = max(1, requested_tm)

    # Multi-TensorCore parts only (v7x): keep >= ~4 steps per core so the
    # double-buffer pipeline has a steady state after "parallel" sharding.
    if n_cores > 1:
        min_steps = 4 * n_cores
        while tm > _SUBLANE and n_rows > tm and pl.cdiv(n_rows, tm) < min_steps:
            tm //= 2

    tm = max(_SUBLANE, (tm // _SUBLANE) * _SUBLANE)
    if tm >= n_rows:
        return n_rows, 1                                  # single full block

    # Prefer a tile that divides n_rows (no partial last block); otherwise
    # rely on Pallas' partial-boundary handling (LN is per-row, so garbage
    # tail rows cannot contaminate valid rows and are never written back).
    for t in range(tm, max(_SUBLANE, tm // 2) - 1, -_SUBLANE):
        if n_rows % t == 0:
            return t, n_rows // t
    return tm, pl.cdiv(n_rows, tm)


def _block_diag_tile(w, p):
    """(a, b) -> (p*a, p*b) with `w` repeated on the diagonal blocks."""
    a, b = w.shape
    eye = jnp.eye(p, dtype=w.dtype)
    return (eye[:, None, :, None] * w[None, :, None, :]).reshape(p * a, p * b)


# --------------------------------------------------------------------------
# Wrapper
# --------------------------------------------------------------------------
def pair_trans(z, gamma, beta, w1, b1, w2, b2, *, eps=1e-5, tm=None,
               use_bf16_matmul=None):
    """PairTrans forward. z: [..., z_dim]; weights stored [in, out]."""
    orig_shape = z.shape
    z_dim = orig_shape[-1]
    hidden = w1.shape[1]
    M = 1
    for s in orig_shape[:-1]:
        M *= int(s)

    # bf16 MXU operands (f32 accumulation) once the matmuls are large enough
    # that f32 MXU emulation would be the binding unit; f32 otherwise.
    if use_bf16_matmul is None:
        use_bf16_matmul = z_dim >= 128
    mxu_dtype = jnp.bfloat16 if use_bf16_matmul else jnp.float32

    # Fold the LayerNorm affine into Linear1 (exact, one-time, outside kernel).
    g32, bt32 = gamma.astype(jnp.float32), beta.astype(jnp.float32)
    w1_32, w2_32 = w1.astype(jnp.float32), w2.astype(jnp.float32)
    w1_eff = g32[:, None] * w1_32
    b1_eff = bt32 @ w1_32 + b1.astype(jnp.float32)
    b2_32 = b2.astype(jnp.float32)

    n_cores = _num_tensorcores()
    vmem_budget = _vmem_budget_bytes()

    packed = False
    if z_dim < _LANE and _LANE % z_dim == 0:
        p = _LANE // z_dim
        packed = (M % p == 0)

    if packed:
        # ---- Lane-dense packed path (z_dim < 128) ----
        mp = M // p
        hid_p = p * hidden
        z2d = z.reshape(mp, _LANE)                           # free row-major view

        stat = _block_diag_tile(
            jnp.full((z_dim, z_dim), 1.0 / z_dim, jnp.float32), p)
        w1_k = _block_diag_tile(w1_eff, p).astype(mxu_dtype)  # (128, P*hidden)
        w2_k = _block_diag_tile(w2_32, p).astype(mxu_dtype)   # (P*hidden, 128)
        b1_k = jnp.tile(b1_eff, p).reshape(1, hid_p)
        b2_k = jnp.tile(b2_32, p).reshape(1, _LANE)

        weight_shapes = [(_LANE, _LANE), (_LANE, hid_p), (1, hid_p),
                         (hid_p, _LANE), (1, _LANE)]
        tile, grid_m = _choose_tile_rows(mp, _LANE, hid_p, _LANE, weight_shapes,
                                         vmem_budget, n_cores, requested_tm=tm)
        need = _kernel_vmem_bytes(tile, _LANE, hid_p, _LANE, weight_shapes)

        kernel = functools.partial(_pair_trans_packed_kernel,
                                   eps=eps, mxu_dtype=mxu_dtype)
        out2d = pl.pallas_call(
            kernel,
            out_shape=jax.ShapeDtypeStruct((mp, _LANE), z.dtype),
            grid_spec=pltpu.PrefetchScalarGridSpec(
                num_scalar_prefetch=0,
                grid=(grid_m,),
                in_specs=[
                    pl.BlockSpec((tile, _LANE), lambda i: (i, 0)),    # packed z
                    pl.BlockSpec((_LANE, _LANE), lambda i: (0, 0)),   # LN stats
                    pl.BlockSpec((_LANE, hid_p), lambda i: (0, 0)),   # W1' blkdiag
                    pl.BlockSpec((1, hid_p), lambda i: (0, 0)),       # b1'
                    pl.BlockSpec((hid_p, _LANE), lambda i: (0, 0)),   # W2 blkdiag
                    pl.BlockSpec((1, _LANE), lambda i: (0, 0)),       # b2
                ],
                out_specs=pl.BlockSpec((tile, _LANE), lambda i: (i, 0)),
            ),
            compiler_params=pltpu.CompilerParams(
                dimension_semantics=("parallel",),
                vmem_limit_bytes=_vmem_limit(need, vmem_budget),
            ),
        )(z2d, stat, w1_k, b1_k, w2_k, b2_k)
        return out2d.reshape(orig_shape)

    # ---- Straightforward path (lane-dense whenever z_dim is a multiple of 128) ----
    z2d = z.reshape(M, z_dim)
    w1_k = w1_eff.astype(mxu_dtype)                          # (z_dim, hidden)
    w2_k = w2_32.astype(mxu_dtype)                           # (hidden, z_dim)
    b1_k = b1_eff.reshape(1, hidden)
    b2_k = b2_32.reshape(1, z_dim)

    weight_shapes = [(z_dim, hidden), (1, hidden), (hidden, z_dim), (1, z_dim)]
    tile, grid_m = _choose_tile_rows(M, z_dim, hidden, z_dim, weight_shapes,
                                     vmem_budget, n_cores, requested_tm=tm)
    need = _kernel_vmem_bytes(tile, z_dim, hidden, z_dim, weight_shapes)

    kernel = functools.partial(_pair_trans_kernel, eps=eps, mxu_dtype=mxu_dtype)
    out2d = pl.pallas_call(
        kernel,
        out_shape=jax.ShapeDtypeStruct((M, z_dim), z.dtype),
        grid_spec=pltpu.PrefetchScalarGridSpec(
            num_scalar_prefetch=0,
            grid=(grid_m,),
            in_specs=[
                pl.BlockSpec((tile, z_dim), lambda i: (i, 0)),        # z rows
                pl.BlockSpec((z_dim, hidden), lambda i: (0, 0)),      # W1'
                pl.BlockSpec((1, hidden), lambda i: (0, 0)),          # b1'
                pl.BlockSpec((hidden, z_dim), lambda i: (0, 0)),      # W2
                pl.BlockSpec((1, z_dim), lambda i: (0, 0)),           # b2
            ],
            out_specs=pl.BlockSpec((tile, z_dim), lambda i: (i, 0)),
        ),
        compiler_params=pltpu.CompilerParams(
            dimension_semantics=("parallel",),
            vmem_limit_bytes=_vmem_limit(need, vmem_budget),
        ),
    )(z2d, w1_k, b1_k, w2_k, b2_k)
    return out2d.reshape(orig_shape)


# --------------------------------------------------------------------------
# Reference and test harness
# --------------------------------------------------------------------------
def _reference(z, gamma, beta, w1, b1, w2, b2, eps=1e-5):
    mean = jnp.mean(z, axis=-1, keepdims=True)
    var = jnp.mean((z - mean) ** 2, axis=-1, keepdims=True)
    zn = (z - mean) * jax.lax.rsqrt(var + eps) * gamma + beta
    h = jnp.maximum(zn @ w1 + b1, 0.0)
    return h @ w2 + b2


def _make_params(key, z_dim, hidden):
    kz, kg, kb, kw1, kb1, kw2, kb2 = jax.random.split(key, 7)
    gamma = 1.0 + 0.1 * jax.random.normal(kg, (z_dim,), jnp.float32)
    beta = 0.1 * jax.random.normal(kb, (z_dim,), jnp.float32)
    w1 = jax.random.normal(kw1, (z_dim, hidden), jnp.float32) / jnp.sqrt(z_dim)
    b1 = 0.01 * jax.random.normal(kb1, (hidden,), jnp.float32)
    w2 = jax.random.normal(kw2, (hidden, z_dim), jnp.float32) / jnp.sqrt(hidden)
    b2 = 0.01 * jax.random.normal(kb2, (z_dim,), jnp.float32)
    return kz, gamma, beta, w1, b1, w2, b2


if __name__ == "__main__":
    B, N, c_expand = 2, 8, 4
    key = jax.random.PRNGKey(0)
    k32, k128 = jax.random.split(key)

    # --- z_dim = 32: lane-dense packed path (4 rows / 128 lanes), f32 MXU ---
    z_dim = 32
    hidden = z_dim * c_expand
    kz, gamma, beta, w1, b1, w2, b2 = _make_params(k32, z_dim, hidden)
    z = jax.random.normal(kz, (B, N, N, z_dim), dtype=jnp.float32)
    ref = _reference(z, gamma, beta, w1, b1, w2, b2)

    out = jax.block_until_ready(pair_trans(z, gamma, beta, w1, b1, w2, b2))
    assert out.shape == z.shape
    err = float(jnp.max(jnp.abs(out - ref)))
    assert err < 1e-4, err

    # Same problem with an explicit small tile -> multi-step grid with
    # resident (revisited) weight blocks; exercises the streaming path.
    out_t = jax.block_until_ready(
        pair_trans(z, gamma, beta, w1, b1, w2, b2, tm=8))
    err_t = float(jnp.max(jnp.abs(out_t - ref)))
    assert err_t < 1e-4, err_t

    # --- z_dim = 128: lane-dense unpacked path; bf16 MXU operands default ---
    z_dim = 128
    hidden = z_dim * c_expand
    kz, gamma, beta, w1, b1, w2, b2 = _make_params(k128, z_dim, hidden)
    z = jax.random.normal(kz, (B, N, N, z_dim), dtype=jnp.float32)
    ref = _reference(z, gamma, beta, w1, b1, w2, b2)

    out_f32 = jax.block_until_ready(
        pair_trans(z, gamma, beta, w1, b1, w2, b2, use_bf16_matmul=False))
    err_f32 = float(jnp.max(jnp.abs(out_f32 - ref)))
    assert err_f32 < 1e-4, err_f32

    out_bf16 = jax.block_until_ready(
        pair_trans(z, gamma, beta, w1, b1, w2, b2))           # bf16 by default
    err_bf16 = float(jnp.max(jnp.abs(out_bf16 - ref)))
    assert err_bf16 < 1e-1, err_bf16

    print("KERNEL_OK")
</pallas_src>

<mosaic_0001>
module attributes {stable_mosaic.version = 11 : i64} {
  func.func @_pair_trans_packed_kernel(%arg0: i32, %arg1: memref<32x128xf32, #tpu.memory_space<vmem>>, %arg2: memref<128x128xf32, #tpu.memory_space<vmem>>, %arg3: memref<128x512xf32, #tpu.memory_space<vmem>>, %arg4: memref<1x512xf32, #tpu.memory_space<vmem>>, %arg5: memref<512x128xf32, #tpu.memory_space<vmem>>, %arg6: memref<1x128xf32, #tpu.memory_space<vmem>>, %arg7: memref<32x128xf32, #tpu.memory_space<vmem>>) attributes {dimension_semantics = [#tpu.dimension_semantics<parallel>], iteration_bounds = array<i64: 1>, scalar_prefetch = 0 : i64, scratch_operands = 0 : i64, tpu.core_type = #tpu.core_type<tc>, window_params = [{transform_indices = @transform_0, window_bounds = array<i64: 32, 128>}, {pipeline_mode = #tpu.pipeline_mode<synchronous>, transform_indices = @transform_1, window_bounds = array<i64: 128, 128>}, {pipeline_mode = #tpu.pipeline_mode<synchronous>, transform_indices = @transform_2, window_bounds = array<i64: 128, 512>}, {pipeline_mode = #tpu.pipeline_mode<synchronous>, transform_indices = @transform_3, window_bounds = array<i64: 1, 512>}, {pipeline_mode = #tpu.pipeline_mode<synchronous>, transform_indices = @transform_4, window_bounds = array<i64: 512, 128>}, {pipeline_mode = #tpu.pipeline_mode<synchronous>, transform_indices = @transform_5, window_bounds = array<i64: 1, 128>}, {transform_indices = @transform_6, window_bounds = array<i64: 32, 128>}]} {
    %c0 = arith.constant 0 : index
    %c0_0 = arith.constant 0 : index
    %0 = vector.load %arg1[%c0, %c0_0] : memref<32x128xf32, #tpu.memory_space<vmem>>, vector<32x128xf32>
    %c0_1 = arith.constant 0 : index
    %c0_2 = arith.constant 0 : index
    %1 = vector.load %arg2[%c0_1, %c0_2] : memref<128x128xf32, #tpu.memory_space<vmem>>, vector<128x128xf32>
    %cst = arith.constant dense<0.000000e+00> : vector<32x128xf32>
    %2 = tpu.matmul %0, %1, %cst {dimension_numbers = #tpu.dot_dimension_numbers<[1], [0], [0], [1], [0, 0, 1, 1], [], []>} : vector<32x128xf32>, vector<128x128xf32>, vector<32x128xf32> -> vector<32x128xf32>
    %3 = arith.subf %0, %2 : vector<32x128xf32>
    %4 = arith.mulf %3, %3 : vector<32x128xf32>
    %cst_3 = arith.constant dense<0.000000e+00> : vector<32x128xf32>
    %5 = tpu.matmul %4, %1, %cst_3 {dimension_numbers = #tpu.dot_dimension_numbers<[1], [0], [0], [1], [0, 0, 1, 1], [], []>} : vector<32x128xf32>, vector<128x128xf32>, vector<32x128xf32> -> vector<32x128xf32>
    %cst_4 = arith.constant 9.99999974E-6 : f32
    %6 = vector.broadcast %cst_4 : f32 to vector<32x128xf32>
    %7 = arith.addf %5, %6 : vector<32x128xf32>
    %8 = math.rsqrt %7 : vector<32x128xf32>
    %9 = arith.mulf %3, %8 : vector<32x128xf32>
    %c0_5 = arith.constant 0 : index
    %c0_6 = arith.constant 0 : index
    %10 = vector.load %arg3[%c0_5, %c0_6] : memref<128x512xf32, #tpu.memory_space<vmem>>, vector<128x512xf32>
    %cst_7 = arith.constant dense<0.000000e+00> : vector<32x512xf32>
    %11 = tpu.matmul %9, %10, %cst_7 {dimension_numbers = #tpu.dot_dimension_numbers<[1], [0], [0], [1], [0, 0, 1, 1], [], []>} : vector<32x128xf32>, vector<128x512xf32>, vector<32x512xf32> -> vector<32x512xf32>
    %c0_8 = arith.constant 0 : index
    %c0_9 = arith.constant 0 : index
    %12 = vector.load %arg4[%c0_8, %c0_9] : memref<1x512xf32, #tpu.memory_space<vmem>>, vector<1x512xf32>
    %13 = vector.broadcast %12 : vector<1x512xf32> to vector<32x512xf32>
    %14 = arith.addf %11, %13 : vector<32x512xf32>
    %cst_10 = arith.constant 0.000000e+00 : f32
    %15 = vector.broadcast %cst_10 : f32 to vector<32x512xf32>
    %16 = arith.maximumf %14, %15 : vector<32x512xf32>
    %c0_11 = arith.constant 0 : index
    %c0_12 = arith.constant 0 : index
    %17 = vector.load %arg5[%c0_11, %c0_12] : memref<512x128xf32, #tpu.memory_space<vmem>>, vector<512x128xf32>
    %cst_13 = arith.constant dense<0.000000e+00> : vector<32x128xf32>
    %18 = tpu.matmul %16, %17, %cst_13 {dimension_numbers = #tpu.dot_dimension_numbers<[1], [0], [0], [1], [0, 0, 1, 1], [], []>} : vector<32x512xf32>, vector<512x128xf32>, vector<32x128xf32> -> vector<32x128xf32>
    %c0_14 = arith.constant 0 : index
    %c0_15 = arith.constant 0 : index
    %19 = vector.load %arg6[%c0_14, %c0_15] : memref<1x128xf32, #tpu.memory_space<vmem>>, vector<1x128xf32>
    %20 = vector.broadcast %19 : vector<1x128xf32> to vector<32x128xf32>
    %21 = arith.addf %18, %20 : vector<32x128xf32>
    %c0_16 = arith.constant 0 : index
    %c0_17 = arith.constant 0 : index
    %22 = vector.load %arg7[%c0_16, %c0_17] : memref<32x128xf32, #tpu.memory_space<vmem>>, vector<32x128xf32>
    tpu.vector_store %arg7[%c0_16, %c0_17], %21 {strides = array<i32>} : memref<32x128xf32, #tpu.memory_space<vmem>>, vector<32x128xf32>,
    return
  }
  func.func @transform_0(%arg0: i32) -> (i32, i32) {
    %c0_i32 = arith.constant 0 : i32
    %c0_i32_0 = arith.constant 0 : i32
    return %arg0, %c0_i32 : i32, i32
  }
  func.func @transform_1(%arg0: i32) -> (i32, i32) {
    %c0_i32 = arith.constant 0 : i32
    %c0_i32_0 = arith.constant 0 : i32
    %c0_i32_1 = arith.constant 0 : i32
    return %c0_i32, %c0_i32_0 : i32, i32
  }
  func.func @transform_2(%arg0: i32) -> (i32, i32) {
    %c0_i32 = arith.constant 0 : i32
    %c0_i32_0 = arith.constant 0 : i32
    %c0_i32_1 = arith.constant 0 : i32
    return %c0_i32, %c0_i32_0 : i32, i32
  }
  func.func @transform_3(%arg0: i32) -> (i32, i32) {
    %c0_i32 = arith.constant 0 : i32
    %c0_i32_0 = arith.constant 0 : i32
    %c0_i32_1 = arith.constant 0 : i32
    return %c0_i32, %c0_i32_0 : i32, i32
  }
  func.func @transform_4(%arg0: i32) -> (i32, i32) {
    %c0_i32 = arith.constant 0 : i32
    %c0_i32_0 = arith.constant 0 : i32
    %c0_i32_1 = arith.constant 0 : i32
    return %c0_i32, %c0_i32_0 : i32, i32
  }
  func.func @transform_5(%arg0: i32) -> (i32, i32) {
    %c0_i32 = arith.constant 0 : i32
    %c0_i32_0 = arith.constant 0 : i32
    %c0_i32_1 = arith.constant 0 : i32
    return %c0_i32, %c0_i32_0 : i32, i32
  }
  func.func @transform_6(%arg0: i32) -> (i32, i32) {
    %c0_i32 = arith.constant 0 : i32
    %c0_i32_0 = arith.constant 0 : i32
    return %arg0, %c0_i32 : i32, i32
  }
}

</mosaic_0001>

<bundles_post_ra>
// kernel: tpu_custom_call.1
= control target key start
LH: loop header
LB: loop body
LE: loop exit
PB: predicated region body
PF: predicated region fallthrough
CT: control target
= control target key end

     0   :  { %11 = vsyncpa [#allocation3], 0  ;;  %s1262_s0 = inlined_call_operand.hbm [shape: f32[32,128], index: 0, kind: input, shape index: {}]   ;;  %s1263_s1 = inlined_call_operand.hbm [shape: f32[128,128], index: 1, kind: input, shape index: {}]   ;;  %s1264_s2 = inlined_call_operand.hbm [shape: f32[128,512], index: 2, kind: input, shape index: {}]   ;;  %s1265_s3 = inlined_call_operand.vmem [shape: f32[1,512], index: 3, kind: input, shape index: {}]   ;;  %s1266_s4 = inlined_call_operand.hbm [shape: f32[512,128], index: 4, kind: input, shape index: {}]   ;;  %s1267_s5 = inlined_call_operand.vmem [shape: f32[1,128], index: 5, kind: input, shape index: {}]   ;;  %s1268_s6 = inlined_call_operand.hbm [shape: f32[32,128], index: 6, kind: output, shape index: {}]  }
   0x1   :  { %12 = vsyncpa [#allocation6], 0 }
   0x2   :  { %13 = vsyncpa [#allocation9], 0 }
   0x3   :  { %14 = vsyncpa [#allocation4], 0  ;;  %s1160_s21 = smov [#allocation5]   ;;  %s1161_s23 = smov [#allocation2]  }
   0x4   :  { %s32_s22 = sshll.u32 %s1160_s21, 4  ;;  %s20_s24 = sshll.u32 %s1161_s23, 4  ;;  %s33_s22 = int_to_ptr.vmem [resolvable:$true] %s32_s22  ;;  %s21_s24 = int_to_ptr.vmem [resolvable:$true] %s20_s24 }
   0x5   :  { %s1060_s25 = scalar_lea.vmem %s33_s22, 2048  ;;  %p1065_p1 = scmp.lt.s32.totalorder %s33_s22, %s33_s22 }
   0x6   :  { %p1061_p0 = scmp.ne.s32.totalorder %s33_s22, %s1060_s25  ;;  %p1066_p2 = scmp.lt.s32.totalorder %s1060_s25, %s1060_s25 }
   0x8   :  { %p1067_p3 = por %p1066_p2, %p1065_p1 }
   0xa   :  { %p1068_p4 = pnand %p1067_p3, %p1061_p0 }
   0xc   :  { %1071 = shalt.err (!%p1068_p4)
}
   0xd   :  { %s1162_s26 = smov 128   ;;  %s1163_s27 = smov 8  }
   0xe   :  { %38 = dma.hbm_to_vmem [thread:$0]  %s1263_s1, 2048, %s33_s22, [#allocation6], %s1162_s26, %s1162_s26, %s1163_s27  }
   0xf   :  { %s1080_s30 = scalar_lea.vmem %s21_s24, 512  ;;  %p1085_p6 = scmp.lt.s32.totalorder %s21_s24, %s21_s24 }
  0x10   :  { %p1081_p5 = scmp.ne.s32.totalorder %s21_s24, %s1080_s30  ;;  %p1086_p7 = scmp.lt.s32.totalorder %s1080_s30, %s1080_s30 }
  0x12   :  { %p1087_p8 = por %p1086_p7, %p1085_p6 }
  0x14   :  { %p1088_p9 = pnand %p1087_p8, %p1081_p5 }
  0x16   :  { %1091 = shalt.err (!%p1088_p9)
}
  0x17   :  { %26 = dma.hbm_to_vmem [thread:$0]  %s1262_s0, 512, %s21_s24, [#allocation3], %s1162_s26, %s1162_s26, %s1163_s27  }
  0x18   :  { %s1164_s9 = smov [#allocation7]  }
  0x19   :  { %s44_s10 = sshll.u32 %s1164_s9, 4  ;;  %s45_s10 = int_to_ptr.vmem [resolvable:$true] %s44_s10 }
  0x1a   :  { %s1100_s11 = scalar_lea.vmem %s45_s10, 8192  ;;  %p1105_p11 = scmp.lt.s32.totalorder %s45_s10, %s45_s10 }
  0x1b   :  { %p1101_p10 = scmp.ne.s32.totalorder %s45_s10, %s1100_s11  ;;  %p1106_p12 = scmp.lt.s32.totalorder %s1100_s11, %s1100_s11 }
  0x1d   :  { %p1107_p13 = por %p1106_p12, %p1105_p11 }
  0x1f   :  { %p1108_p0 = pnand %p1107_p13, %p1101_p10 }
  0x21   :  { %1111 = shalt.err (!%p1108_p0)
}
  0x22   :  { %s1165_s1 = smov 512   ;;  %s1166_s12 = smov 32  }
  0x23   :  { %50 = dma.hbm_to_vmem [thread:$0]  %s1264_s2, 8192, %s45_s10, [#allocation6], %s1165_s1, %s1165_s1, %s1166_s12  }
  0x24   :  { %s1167_s15 = smov [#allocation8]  }
  0x25   :  { %s58_s16 = sshll.u32 %s1167_s15, 4  ;;  %s59_s16 = int_to_ptr.vmem [resolvable:$true] %s58_s16 }
  0x26   :  { %s1120_s0 = scalar_lea.vmem %s59_s16, 8192  ;;  %p1125_p2 = scmp.lt.s32.totalorder %s59_s16, %s59_s16 }
  0x27   :  { %p1121_p1 = scmp.ne.s32.totalorder %s59_s16, %s1120_s0  ;;  %p1126_p3 = scmp.lt.s32.totalorder %s1120_s0, %s1120_s0 }
  0x29   :  { %p1127_p4 = por %p1126_p3, %p1125_p2 }
  0x2b   :  { %p1128_p5 = pnand %p1127_p4, %p1121_p1 }
  0x2d   :  { %1131 = shalt.err (!%p1128_p5)
}
  0x2e   :  { %64 = dma.hbm_to_vmem [thread:$0]  %s1266_s4, 8192, %s59_s16, [#allocation9], %s1162_s26, %s1162_s26, %s1163_s27  }
  0x2f   :  { %1152 = dma.done.wait [#allocation3], 512  }
  0x30   :  { %1153 = vsyncadd [#allocation3], 4294966784 }
  0x31   :  { %1154 = dma.done.wait [#allocation6], 10240  }
  0x32   :  { %1155 = vsyncadd [#allocation6], 4294957056 }
  0x33   :  { %1156 = dma.done.wait [#allocation9], 8192  }
  0x34   :  { %1157 = vsyncadd [#allocation9], 4294959104  ;;  %v98_v0 = vld [vmem:[#allocation5 + $0x78] sm:$0xff]  ;;  %v97_v1 = vld [vmem:[#allocation5 + $0x70] sm:$0xff] }
  0x35   :  { %958 = vmatprep.subr.mxu0 %v98_v0  ;;  %996 = vmatprep.subr.mxu1 %v98_v0  ;;  %v96_v2 = vld [vmem:[#allocation5 + $0x68] sm:$0xff]  ;;  %v95_v3 = vld [vmem:[#allocation5 + $0x60] sm:$0xff]  ;;  %v94_v5 = vld [vmem:[#allocation5 + $0x58] sm:$0xff] }
  0x36   :  { %959 = vmatpush3.msra.mxu0 %v98_v0  ;;  %997 = vmatpush3.msra.mxu1 %v98_v0  ;;  %v1226_v4 = vld [vmem:[#allocation2] sm:$0xff]  ;;  %v93_v6 = vld [vmem:[#allocation5 + $0x50] sm:$0xff]  ;;  %v92_v7 = vld [vmem:[#allocation5 + $0x48] sm:$0xff] }
  0x37   :  { %960 = vmatprep.subr.mxu0 %v97_v1  ;;  %998 = vmatprep.subr.mxu1 %v97_v1  ;;  %v91_v8 = vld [vmem:[#allocation5 + $0x40] sm:$0xff]  ;;  %v90_v9 = vld [vmem:[#allocation5 + $0x38] sm:$0xff]  ;;  %v89_v10 = vld [vmem:[#allocation5 + $0x30] sm:$0xff] }
  0x38   :  { %961 = vmatpush3.msra.mxu0 %v97_v1  ;;  %999 = vmatpush3.msra.mxu1 %v97_v1  ;;  %v88_v11 = vld [vmem:[#allocation5 + $0x28] sm:$0xff]  ;;  %v87_v12 = vld [vmem:[#allocation5 + $0x20] sm:$0xff]  ;;  %v86_v13 = vld [vmem:[#allocation5 + $0x18] sm:$0xff] }
  0x39   :  { %962 = vmatprep.subr.mxu0 %v96_v2  ;;  %1000 = vmatprep.subr.mxu1 %v96_v2  ;;  %v85_v14 = vld [vmem:[#allocation5 + $0x10] sm:$0xff]  ;;  %v84_v15 = vld [vmem:[#allocation5 + $0x8] sm:$0xff]  ;;  %v83_v16 = vld [vmem:[#allocation5] sm:$0xff] }
  0x3a   :  { %963 = vmatpush3.msra.mxu0 %v96_v2  ;;  %990 = vmatprep.mubr.f32.mxu0 %v1226_v4  ;;  %v80_v17 = vld [vmem:[#allocation2 + $0x8] sm:$0xff]  ;;  %v81_v18 = vld [vmem:[#allocation2 + $0x10] sm:$0xff]  ;;  %v82_v19 = vld [vmem:[#allocation2 + $0x18] sm:$0xff] }
  0x3b   :  { %964 = vmatprep.subr.mxu0 %v95_v3  ;;  %1001 = vmatpush3.msra.mxu1 %v96_v2  ;;  %v346_v20 = vld [vmem:[#allocation7 + $0x1e8] sm:$0xff]  ;;  %v348_v21 = vld [vmem:[#allocation7 + $0x1f8] sm:$0xff]  ;;  %v345_v22 = vld [vmem:[#allocation7 + $0x1e0] sm:$0xff] }
  0x3c   :  { %965 = vmatpush3.msra.mxu0 %v95_v3  ;;  %1002 = vmatprep.subr.mxu1 %v95_v3  ;;  %v342_v23 = vld [vmem:[#allocation7 + $0x1c8] sm:$0xff]  ;;  %v341_v24 = vld [vmem:[#allocation7 + $0x1c0] sm:$0xff]  ;;  %v347_v41 = vld [vmem:[#allocation7 + $0x1f0] sm:$0xff] }
  0x3d   :  { %966 = vmatprep.subr.mxu0 %v94_v5  ;;  %1003 = vmatpush3.msra.mxu1 %v95_v3  ;;  %v338_v25 = vld [vmem:[#allocation7 + $0x1a8] sm:$0xff]  ;;  %v337_v26 = vld [vmem:[#allocation7 + $0x1a0] sm:$0xff]  ;;  %v344_v43 = vld [vmem:[#allocation7 + $0x1d8] sm:$0xff] }
  0x3e   :  { %967 = vmatpush3.msra.mxu0 %v94_v5  ;;  %1004 = vmatprep.subr.mxu1 %v94_v5  ;;  %v334_v27 = vld [vmem:[#allocation7 + $0x188] sm:$0xff]  ;;  %v333_v28 = vld [vmem:[#allocation7 + $0x180] sm:$0xff]  ;;  %v343_v45 = vld [vmem:[#allocation7 + $0x1d0] sm:$0xff] }
  0x3f   :  { %968 = vmatprep.subr.mxu0 %v93_v6  ;;  %1005 = vmatpush3.msra.mxu1 %v94_v5  ;;  %v330_v29 = vld [vmem:[#allocation7 + $0x168] sm:$0xff]  ;;  %v329_v30 = vld [vmem:[#allocation7 + $0x160] sm:$0xff]  ;;  %v340_v47 = vld [vmem:[#allocation7 + $0x1b8] sm:$0xff] }
  0x40   :  { %969 = vmatpush3.msra.mxu0 %v93_v6  ;;  %1006 = vmatprep.subr.mxu1 %v93_v6  ;;  %v326_v31 = vld [vmem:[#allocation7 + $0x148] sm:$0xff]  ;;  %v339_v48 = vld [vmem:[#allocation7 + $0x1b0] sm:$0xff]  ;;  %v336_v49 = vld [vmem:[#allocation7 + $0x198] sm:$0xff] }
  0x41   :  { %970 = vmatprep.subr.mxu0 %v92_v7  ;;  %1007 = vmatpush3.msra.mxu1 %v93_v6  ;;  %v335_v50 = vld [vmem:[#allocation7 + $0x190] sm:$0xff]  ;;  %v332_v51 = vld [vmem:[#allocation7 + $0x178] sm:$0xff]  ;;  %v325_v54 = vld [vmem:[#allocation7 + $0x140] sm:$0xff] }
  0x42   :  { %971 = vmatpush3.msra.mxu0 %v92_v7  ;;  %1008 = vmatprep.subr.mxu1 %v92_v7  ;;  %v331_v52 = vld [vmem:[#allocation7 + $0x170] sm:$0xff]  ;;  %v328_v53 = vld [vmem:[#allocation7 + $0x158] sm:$0xff]  ;;  %v322_v56 = vld [vmem:[#allocation7 + $0x128] sm:$0xff] }
  0x43   :  { %972 = vmatprep.subr.mxu0 %v91_v8  ;;  %1009 = vmatpush3.msra.mxu1 %v92_v7  ;;  %v327_v55 = vld [vmem:[#allocation7 + $0x150] sm:$0xff]  ;;  %v324_v57 = vld [vmem:[#allocation7 + $0x138] sm:$0xff]  ;;  %v321_v58 = vld [vmem:[#allocation7 + $0x120] sm:$0xff] }
  0x44   :  { %973 = vmatpush3.msra.mxu0 %v91_v8  ;;  %1010 = vmatprep.subr.mxu1 %v91_v8  ;;  %v323_v59 = vld [vmem:[#allocation7 + $0x130] sm:$0xff]  ;;  %v318_v60 = vld [vmem:[#allocation7 + $0x108] sm:$0xff]  ;;  %v320_v61 = vld [vmem:[#allocation7 + $0x118] sm:$0xff] }
  0x45   :  { %974 = vmatprep.subr.mxu0 %v90_v9  ;;  %1011 = vmatpush3.msra.mxu1 %v91_v8  ;;  %v317_v62 = vld [vmem:[#allocation7 + $0x100] sm:$0xff]  ;;  %v319_v63 = vld [vmem:[#allocation7 + $0x110] sm:$0xff]  ;;  %v314_v0 = vld [vmem:[#allocation7 + $0xe8] sm:$0xff] }
  0x46   :  { %975 = vmatpush3.msra.mxu0 %v90_v9  ;;  %1012 = vmatprep.subr.mxu1 %v90_v9  ;;  %v316_v1 = vld [vmem:[#allocation7 + $0xf8] sm:$0xff]  ;;  %v313_v2 = vld [vmem:[#allocation7 + $0xe0] sm:$0xff]  ;;  %v315_v3 = vld [vmem:[#allocation7 + $0xf0] sm:$0xff] }
  0x47   :  { %976 = vmatprep.subr.mxu0 %v89_v10  ;;  %1013 = vmatpush3.msra.mxu1 %v90_v9  ;;  %v312_v5 = vld [vmem:[#allocation7 + $0xd8] sm:$0xff]  ;;  %v309_v6 = vld [vmem:[#allocation7 + $0xc0] sm:$0xff]  ;;  %v311_v7 = vld [vmem:[#allocation7 + $0xd0] sm:$0xff] }
  0x48   :  { %977 = vmatpush3.msra.mxu0 %v89_v10  ;;  %1014 = vmatprep.subr.mxu1 %v89_v10  ;;  %v306_v8 = vld [vmem:[#allocation7 + $0xa8] sm:$0xff]  ;;  %v308_v9 = vld [vmem:[#allocation7 + $0xb8] sm:$0xff] }
  0x49   :  { %978 = vmatprep.subr.mxu0 %v88_v11  ;;  %1015 = vmatpush3.msra.mxu1 %v89_v10  ;;  %v305_v10 = vld [vmem:[#allocation7 + $0xa0] sm:$0xff] }
  0x4a   :  { %979 = vmatpush3.msra.mxu0 %v88_v11  ;;  %1016 = vmatprep.subr.mxu1 %v88_v11 }
  0x4b   :  { %980 = vmatprep.subr.mxu0 %v87_v12  ;;  %1017 = vmatpush3.msra.mxu1 %v88_v11  ;;  %v307_v11 = vld [vmem:[#allocation7 + $0xb0] sm:$0xff] }
  0x4c   :  { %981 = vmatpush3.msra.mxu0 %v87_v12  ;;  %1018 = vmatprep.subr.mxu1 %v87_v12 }
  0x4d   :  { %982 = vmatprep.subr.mxu0 %v86_v13  ;;  %1019 = vmatpush3.msra.mxu1 %v87_v12  ;;  %v302_v12 = vld [vmem:[#allocation7 + $0x88] sm:$0xff] }
  0x4e   :  { %983 = vmatpush3.msra.mxu0 %v86_v13  ;;  %1020 = vmatprep.subr.mxu1 %v86_v13 }
  0x4f   :  { %984 = vmatprep.subr.mxu0 %v85_v14  ;;  %1021 = vmatpush3.msra.mxu1 %v86_v13  ;;  %v304_v13 = vld [vmem:[#allocation7 + $0x98] sm:$0xff] }
  0x50   :  { %985 = vmatpush3.msra.mxu0 %v85_v14  ;;  %1022 = vmatprep.subr.mxu1 %v85_v14 }
  0x51   :  { %986 = vmatprep.subr.mxu0 %v84_v15  ;;  %1023 = vmatpush3.msra.mxu1 %v85_v14  ;;  %v301_v14 = vld [vmem:[#allocation7 + $0x80] sm:$0xff] }
  0x52   :  { %987 = vmatpush3.msra.mxu0 %v84_v15  ;;  %1024 = vmatprep.subr.mxu1 %v84_v15 }
  0x53   :  { %988 = vmatprep.subr.mxu0 %v83_v16  ;;  %1025 = vmatpush3.msra.mxu1 %v84_v15  ;;  %v303_v15 = vld [vmem:[#allocation7 + $0x90] sm:$0xff] }
  0x54   :  { %989 = vmatpush3.msra.mxu0 %v83_v16  ;;  %1026 = vmatprep.subr.mxu1 %v83_v16 }
  0x55   :  { %991 = vmatmul.mubr.f32.vlgmr.msra.gmra.mxu0 %v80_v17  ;;  %1027 = vmatpush3.msra.mxu1 %v83_v16  ;;  %v298_v16 = vld [vmem:[#allocation7 + $0x68] sm:$0xff] }
  0x56   :  { %993 = vmatprep.mubr.f32.mxu0 %v81_v18  ;;  %371 = vmatprep.subr.mxu0 %v346_v20  ;;  %v294_v20 = vld [vmem:[#allocation7 + $0x48] sm:$0xff] }
  0x57   :  { %460 = vmatprep.subr.mxu1 %v348_v21  ;;  %372 = vmatpush1.msra.mxu0 %v345_v22  ;;  %v296_v21 = vld [vmem:[#allocation7 + $0x58] sm:$0xff]  ;;  %v293_v22 = vld [vmem:[#allocation7 + $0x40] sm:$0xff] }
  0x58   :  { %373 = vmatprep.subr.mxu0 %v342_v23  ;;  %v295_v23 = vld [vmem:[#allocation7 + $0x50] sm:$0xff] }
  0x59   :  { %994 = vmatmul.mubr.f32.gmra.mxu0 %v82_v19 }
  0x5a   :  { %374 = vmatpush1.msra.mxu0 %v341_v24  ;;  %v290_v24 = vld [vmem:[#allocation7 + $0x28] sm:$0xff] }
  0x5b   :  { %375 = vmatprep.subr.mxu0 %v338_v25  ;;  %v292_v25 = vld [vmem:[#allocation7 + $0x38] sm:$0xff] }
  0x5c   :  { %376 = vmatpush1.msra.mxu0 %v337_v26  ;;  %v289_v26 = vld [vmem:[#allocation7 + $0x20] sm:$0xff] }
  0x5d   :  { %377 = vmatprep.subr.mxu0 %v334_v27  ;;  %v291_v27 = vld [vmem:[#allocation7 + $0x30] sm:$0xff] }
  0x5e   :  { %378 = vmatpush1.msra.mxu0 %v333_v28  ;;  %v286_v28 = vld [vmem:[#allocation7 + $0x8] sm:$0xff] }
  0x5f   :  { %379 = vmatprep.subr.mxu0 %v330_v29  ;;  %v288_v29 = vld [vmem:[#allocation7 + $0x18] sm:$0xff] }
  0x60   :  { %380 = vmatpush1.msra.mxu0 %v329_v30  ;;  %v285_v30 = vld [vmem:[#allocation7] sm:$0xff] }
  0x61   :  { %381 = vmatprep.subr.mxu0 %v326_v31  ;;  %v287_v31 = vld [vmem:[#allocation7 + $0x10] sm:$0xff] }
  0x62   :  { %382 = vmatpush1.msra.mxu0 %v325_v54 }
  0x63   :  { %383 = vmatprep.subr.mxu0 %v322_v56  ;;  %v579_v56 = vld [vmem:[#allocation8 + $0x70] sm:$0xff] }
  0x64   :  { %384 = vmatpush1.msra.mxu0 %v321_v58  ;;  %v626_v58 = vld [vmem:[#allocation8 + $0x1e8] sm:$0xff] }
  0x65   :  { %385 = vmatprep.subr.mxu0 %v318_v60 }
  0x66   :  { %386 = vmatpush1.msra.mxu0 %v317_v62  ;;  %v593_v62 = vld [vmem:[#allocation8 + $0xe0] sm:$0xff] }
  0x67   :  { %387 = vmatprep.subr.mxu0 %v314_v0 }
  0x68   :  { %388 = vmatpush1.msra.mxu0 %v313_v2  ;;  %v609_v2 = vld [vmem:[#allocation8 + $0x160] sm:$0xff] }
 0x115   :  { %v992_v32 = vpop.f32.mrf.mxu0 }
 0x116   :  { %v1229_v33 = vsub.f32 %v80_v17, %v992_v32  ;;  %v300_v17 = vld [vmem:[#allocation7 + $0x78] sm:$0xff]  ;;  %v1168_v32 = vmov 0.0  }
 0x117   :  { %v165_v34 = vpop.f32.mrf.mxu0  ;;  %435 = vmatprep.mubr.f32.mxu0 %v1168_v32 }
 0x118   :  { %v1232_v35 = vsub.f32 %v1226_v4, %v165_v34  ;;  %v189_v39 = vmul.f32 %v1229_v33, %v1229_v33  ;;  %v310_v4 = vld [vmem:[#allocation7 + $0xc8] sm:$0xff]  ;;  %v596_v34 = vld [vmem:[#allocation8 + $0xf8] sm:$0xff] }
 0x119   :  { %v995_v36 = vpop.f32.mrf.mxu0  ;;  %389 = vmatprep.subr.mxu0 %v310_v4  ;;  %v576_v4 = vld [vmem:[#allocation8 + $0x58] sm:$0xff] }
 0x11a   :  { %v1234_v37 = vsub.f32 %v82_v19, %v995_v36  ;;  %v188_v38 = vmul.f32 %v1232_v35, %v1232_v35  ;;  %390 = vmatpush1.msra.mxu0 %v309_v6  ;;  %v299_v19 = vld [vmem:[#allocation7 + $0x70] sm:$0xff]  ;;  %v628_v36 = vld [vmem:[#allocation8 + $0x1f8] sm:$0xff] }
 0x11b   :  { %v175_v40 = vpop.f32.mrf.mxu0  ;;  %391 = vmatprep.subr.mxu0 %v306_v8  ;;  %v591_v6 = vld [vmem:[#allocation8 + $0xd0] sm:$0xff] }
 0x11c   :  { %v1240_v42 = vsub.f32 %v81_v18, %v175_v40  ;;  %1028 = vmatprep.mubr.f32.mxu1 %v188_v38  ;;  %v191_v44 = vmul.f32 %v1234_v37, %v1234_v37  ;;  %392 = vmatpush1.msra.mxu0 %v305_v10  ;;  %v297_v18 = vld [vmem:[#allocation7 + $0x60] sm:$0xff]  ;;  %v575_v8 = vld [vmem:[#allocation8 + $0x50] sm:$0xff]  ;;  %v622_v10 = vld [vmem:[#allocation8 + $0x1c8] sm:$0xff] }
 0x11d   :  { %1029 = vmatmul.mubr.f32.vlgmr.msra.gmra.mxu1 %v189_v39  ;;  %393 = vmatprep.subr.mxu0 %v302_v12  ;;  %v606_v12 = vld [vmem:[#allocation8 + $0x148] sm:$0xff] }
 0x11e   :  { %v190_v46 = vmul.f32 %v1240_v42, %v1240_v42  ;;  %461 = vmatpush1.msra.mxu1 %v347_v41  ;;  %394 = vmatpush1.msra.mxu0 %v301_v14  ;;  %v621_v14 = vld [vmem:[#allocation8 + $0x1c0] sm:$0xff] }
 0x11f   :  { %462 = vmatprep.subr.mxu1 %v344_v43  ;;  %395 = vmatprep.subr.mxu0 %v298_v16  ;;  %v605_v16 = vld [vmem:[#allocation8 + $0x140] sm:$0xff] }
 0x120   :  { %1031 = vmatprep.mubr.f32.mxu1 %v190_v46  ;;  %463 = vmatpush1.msra.mxu1 %v343_v45 }
 0x121   :  { %1032 = vmatmul.mubr.f32.gmra.mxu1 %v191_v44  ;;  %464 = vmatprep.subr.mxu1 %v340_v47 }
 0x122   :  { %465 = vmatpush1.msra.mxu1 %v339_v48  ;;  %396 = vmatpush1.msra.mxu0 %v297_v18  ;;  %v620_v18 = vld [vmem:[#allocation8 + $0x1b8] sm:$0xff] }
 0x123   :  { %466 = vmatprep.subr.mxu1 %v336_v49  ;;  %397 = vmatprep.subr.mxu0 %v294_v20  ;;  %v604_v20 = vld [vmem:[#allocation8 + $0x138] sm:$0xff] }
 0x124   :  { %467 = vmatpush1.msra.mxu1 %v335_v50  ;;  %398 = vmatpush1.msra.mxu0 %v293_v22  ;;  %v580_v50 = vld [vmem:[#allocation8 + $0x78] sm:$0xff]  ;;  %v619_v22 = vld [vmem:[#allocation8 + $0x1b0] sm:$0xff] }
 0x125   :  { %468 = vmatprep.subr.mxu1 %v332_v51  ;;  %399 = vmatprep.subr.mxu0 %v290_v24  ;;  %v612_v51 = vld [vmem:[#allocation8 + $0x178] sm:$0xff]  ;;  %v603_v24 = vld [vmem:[#allocation8 + $0x130] sm:$0xff] }
 0x126   :  { %469 = vmatpush1.msra.mxu1 %v331_v52  ;;  %400 = vmatpush1.msra.mxu0 %v289_v26  ;;  %v595_v52 = vld [vmem:[#allocation8 + $0xf0] sm:$0xff]  ;;  %v618_v26 = vld [vmem:[#allocation8 + $0x1a8] sm:$0xff] }
 0x127   :  { %470 = vmatprep.subr.mxu1 %v328_v53  ;;  %401 = vmatprep.subr.mxu0 %v286_v28  ;;  %v627_v53 = vld [vmem:[#allocation8 + $0x1f0] sm:$0xff]  ;;  %v602_v28 = vld [vmem:[#allocation8 + $0x128] sm:$0xff] }
 0x128   :  { %471 = vmatpush1.msra.mxu1 %v327_v55  ;;  %402 = vmatpush1.msra.mxu0 %v285_v30  ;;  %v617_v30 = vld [vmem:[#allocation8 + $0x1a0] sm:$0xff] }
 0x129   :  { %472 = vmatprep.subr.mxu1 %v324_v57  ;;  %524 = vmatprep.mubr.f32.mxu1 %v1168_v32  ;;  %v611_v57 = vld [vmem:[#allocation8 + $0x170] sm:$0xff] }
 0x12a   :  { %473 = vmatpush1.msra.mxu1 %v323_v59  ;;  %870 = vmatprep.subr.mxu0 %v596_v34  ;;  %v584_v34 = vld [vmem:[#allocation8 + $0x98] sm:$0xff] }
 0x12b   :  { %474 = vmatprep.subr.mxu1 %v320_v61  ;;  %v610_v61 = vld [vmem:[#allocation8 + $0x168] sm:$0xff] }
 0x12c   :  { %475 = vmatpush1.msra.mxu1 %v319_v63  ;;  %v625_v63 = vld [vmem:[#allocation8 + $0x1e0] sm:$0xff] }
 0x12d   :  { %476 = vmatprep.subr.mxu1 %v316_v1  ;;  %v577_v1 = vld [vmem:[#allocation8 + $0x60] sm:$0xff] }
 0x12e   :  { %477 = vmatpush1.msra.mxu1 %v315_v3  ;;  %v624_v3 = vld [vmem:[#allocation8 + $0x1d8] sm:$0xff] }
 0x12f   :  { %478 = vmatprep.subr.mxu1 %v312_v5  ;;  %v608_v5 = vld [vmem:[#allocation8 + $0x158] sm:$0xff] }
 0x130   :  { %479 = vmatpush1.msra.mxu1 %v311_v7  ;;  %v623_v7 = vld [vmem:[#allocation8 + $0x1d0] sm:$0xff] }
 0x131   :  { %480 = vmatprep.subr.mxu1 %v308_v9  ;;  %v590_v9 = vld [vmem:[#allocation8 + $0xc8] sm:$0xff] }
 0x132   :  { %481 = vmatpush1.msra.mxu1 %v307_v11  ;;  %v574_v11 = vld [vmem:[#allocation8 + $0x48] sm:$0xff] }
 0x133   :  { %482 = vmatprep.subr.mxu1 %v304_v13  ;;  %v589_v13 = vld [vmem:[#allocation8 + $0xc0] sm:$0xff] }
 0x134   :  { %483 = vmatpush1.msra.mxu1 %v303_v15  ;;  %v573_v15 = vld [vmem:[#allocation8 + $0x40] sm:$0xff] }
 0x135   :  { %484 = vmatprep.subr.mxu1 %v300_v17  ;;  %v588_v17 = vld [vmem:[#allocation8 + $0xb8] sm:$0xff] }
 0x136   :  { %485 = vmatpush1.msra.mxu1 %v299_v19  ;;  %v572_v19 = vld [vmem:[#allocation8 + $0x38] sm:$0xff] }
 0x137   :  { %486 = vmatprep.subr.mxu1 %v296_v21  ;;  %v587_v21 = vld [vmem:[#allocation8 + $0xb0] sm:$0xff] }
 0x138   :  { %487 = vmatpush1.msra.mxu1 %v295_v23  ;;  %v571_v23 = vld [vmem:[#allocation8 + $0x30] sm:$0xff] }
 0x139   :  { %488 = vmatprep.subr.mxu1 %v292_v25  ;;  %v586_v25 = vld [vmem:[#allocation8 + $0xa8] sm:$0xff] }
 0x13a   :  { %489 = vmatpush1.msra.mxu1 %v291_v27  ;;  %v570_v27 = vld [vmem:[#allocation8 + $0x28] sm:$0xff] }
 0x13b   :  { %490 = vmatprep.subr.mxu1 %v288_v29  ;;  %v585_v29 = vld [vmem:[#allocation8 + $0xa0] sm:$0xff] }
 0x13c   :  { %491 = vmatpush1.msra.mxu1 %v287_v31  ;;  %v569_v31 = vld [vmem:[#allocation8 + $0x20] sm:$0xff] }
 0x13d   :  { %914 = vmatprep.subr.mxu1 %v628_v36  ;;  %v616_v36 = vld [vmem:[#allocation8 + $0x198] sm:$0xff] }
 0x1dd   :  { %v1030_v38 = vpop.f32.mrf.mxu1 }
 0x1de   :  { %v264_v40 = vadd.f32 1e-05, %v1030_v38  ;;  %v568_v38 = vld [vmem:[#allocation8 + $0x18] sm:$0xff] }
 0x1df   :  { %v258_v39 = vpop.f32.mrf.mxu1 }
 0x1e0   :  { %v259_v41 = vadd.f32 1e-05, %v258_v39  ;;  %v600_v39 = vld [vmem:[#allocation8 + $0x118] sm:$0xff] }
 0x1e1   :  { %v1033_v43 = vpop.f32.mrf.mxu1 }
 0x1e2   :  { %1044 = vrsqrt.f32 %v259_v41  ;;  %v274_v46 = vadd.f32 1e-05, %v1033_v43  ;;  %v615_v41 = vld [vmem:[#allocation8 + $0x190] sm:$0xff] }
 0x1e3   :  { %v268_v44 = vpop.f32.mrf.mxu1  ;;  %1046 = vrsqrt.f32 %v264_v40  ;;  %v583_v40 = vld [vmem:[#allocation8 + $0x90] sm:$0xff] }
 0x1e4   :  { %v269_v45 = vadd.f32 1e-05, %v268_v44  ;;  %v567_v43 = vld [vmem:[#allocation8 + $0x10] sm:$0xff] }
 0x1e5   :  { %v599_v44 = vld [vmem:[#allocation8 + $0x110] sm:$0xff] }
 0x1e6   :  { %1048 = vrsqrt.f32 %v269_v45  ;;  %v582_v45 = vld [vmem:[#allocation8 + $0x88] sm:$0xff] }
 0x1e7   :  { %1050 = vrsqrt.f32 %v274_v46  ;;  %v614_v46 = vld [vmem:[#allocation8 + $0x188] sm:$0xff] }
 0x1ef   :  { %v1045_v47 = vpop.eup %1044 }
 0x1f0   :  { %v281_v48 = vmul.f32 %v1045_v47, %v1232_v35  ;;  %v1047_v49 = vpop.eup %1046  ;;  %v594_v35 = vld [vmem:[#allocation8 + $0xe8] sm:$0xff] }
 0x1f1   :  { %v282_v54 = vmul.f32 %v1047_v49, %v1229_v33  ;;  %v578_v33 = vld [vmem:[#allocation8 + $0x68] sm:$0xff]  ;;  %v581_v49 = vld [vmem:[#allocation8 + $0x80] sm:$0xff] }
 0x1f2   :  { %436 = vmatmul.mubr.f32.vlgmr.msra.gmra.mxu0 %v281_v48  ;;  %525 = vmatmul.mubr.f32.vlgmr.msra.gmra.mxu1 %v281_v48  ;;  %v566_v47 = vld [vmem:[#allocation8 + $0x8] sm:$0xff] }
 0x1f3   :  { %441 = vmatprep.mubr.f32.mxu0 %v1168_v32  ;;  %530 = vmatprep.mubr.f32.mxu1 %v1168_v32  ;;  %v1049_v55 = vpop.eup %1048  ;;  %v598_v48 = vld [vmem:[#allocation8 + $0x108] sm:$0xff] }
 0x1f4   :  { %871 = vmatpush3.msra.mxu0 %v580_v50  ;;  %915 = vmatpush3.msra.mxu1 %v612_v51  ;;  %v283_v59 = vmul.f32 %v1049_v55, %v1240_v42  ;;  %v1051_v60 = vpop.eup %1050  ;;  %v592_v42 = vld [vmem:[#allocation8 + $0xd8] sm:$0xff]  ;;  %v613_v50 = vld [vmem:[#allocation8 + $0x180] sm:$0xff] }
 0x1f5   :  { %872 = vmatprep.subr.mxu0 %v595_v52  ;;  %916 = vmatprep.subr.mxu1 %v627_v53  ;;  %v284_v0 = vmul.f32 %v1051_v60, %v1234_v37  ;;  %v607_v37 = vld [vmem:[#allocation8 + $0x150] sm:$0xff]  ;;  %v565_v51 = vld [vmem:[#allocation8] sm:$0xff]  ;;  %v351_v53 = vlaneseq }
 0x1f6   :  { %442 = vmatmul.mubr.f32.gmra.mxu0 %v282_v54  ;;  %531 = vmatmul.mubr.f32.gmra.mxu1 %v282_v54  ;;  %v597_v52 = vld [vmem:[#allocation8 + $0x100] sm:$0xff] }
 0x1f7   :  { %447 = vmatprep.mubr.f32.mxu0 %v1168_v32  ;;  %536 = vmatprep.mubr.f32.mxu1 %v1168_v32  ;;  %v352_v54 = vshrl.u32 %v351_v53, 7 }
 0x1f8   :  { %873 = vmatpush3.msra.mxu0 %v579_v56  ;;  %917 = vmatpush3.msra.mxu1 %v611_v57  ;;  %v349_v57 = vld [vmem:[%s1265_s3] sm:$0xf] }
 0x1f9   :  { %874 = vmatprep.subr.mxu0 %v594_v35  ;;  %918 = vmatprep.subr.mxu1 %v626_v58  ;;  %v353_v55 = vsub.s32 0, %v352_v54  ;;  %v361_v56 = vsub.s32 2, %v352_v54  ;;  %v357_v35 = vsub.s32 1, %v352_v54  ;;  %v365_v58 = vsub.s32 3, %v352_v54 }
 0x1fa   :  { %448 = vmatmul.mubr.f32.gmra.mxu0 %v283_v59  ;;  %537 = vmatmul.mubr.f32.gmra.mxu1 %v283_v59 }
 0x1fb   :  { %453 = vmatprep.mubr.f32.mxu0 %v1168_v32  ;;  %542 = vmatprep.mubr.f32.mxu1 %v1168_v32  ;;  %v601_v32 = vld [vmem:[#allocation8 + $0x120] sm:$0xff]  ;;  %v354_v59 = vrot.slane %v349_v57, %v353_v55  ;;  %v362_v60 = vrot.slane %v349_v57, %v361_v56 }
 0x1fc   :  { %875 = vmatpush3.msra.mxu0 %v578_v33  ;;  %919 = vmatpush3.msra.mxu1 %v610_v61  ;;  %v358_v33 = vrot.slane %v349_v57, %v357_v35  ;;  %v366_v61 = vrot.slane %v349_v57, %v365_v58 }
 0x1fd   :  { %876 = vmatprep.subr.mxu0 %v593_v62  ;;  %920 = vmatprep.subr.mxu1 %v625_v63 }
 0x1fe   :  { %454 = vmatmul.mubr.f32.gmra.mxu0 %v284_v0  ;;  %543 = vmatmul.mubr.f32.gmra.mxu1 %v284_v0 }
 0x1ff   :  { %877 = vmatpush3.msra.mxu0 %v577_v1  ;;  %921 = vmatpush3.msra.mxu1 %v609_v2 }
 0x200   :  { %878 = vmatprep.subr.mxu0 %v592_v42  ;;  %922 = vmatprep.subr.mxu1 %v624_v3 }
 0x201   :  { %879 = vmatpush3.msra.mxu0 %v576_v4  ;;  %923 = vmatpush3.msra.mxu1 %v608_v5 }
 0x202   :  { %880 = vmatprep.subr.mxu0 %v591_v6  ;;  %924 = vmatprep.subr.mxu1 %v623_v7 }
 0x203   :  { %881 = vmatpush3.msra.mxu0 %v575_v8  ;;  %925 = vmatpush3.msra.mxu1 %v607_v37 }
 0x204   :  { %882 = vmatprep.subr.mxu0 %v590_v9  ;;  %926 = vmatprep.subr.mxu1 %v622_v10 }
 0x205   :  { %883 = vmatpush3.msra.mxu0 %v574_v11  ;;  %927 = vmatpush3.msra.mxu1 %v606_v12 }
 0x206   :  { %884 = vmatprep.subr.mxu0 %v589_v13  ;;  %928 = vmatprep.subr.mxu1 %v621_v14 }
 0x207   :  { %885 = vmatpush3.msra.mxu0 %v573_v15  ;;  %929 = vmatpush3.msra.mxu1 %v605_v16 }
 0x208   :  { %886 = vmatprep.subr.mxu0 %v588_v17  ;;  %930 = vmatprep.subr.mxu1 %v620_v18 }
 0x209   :  { %887 = vmatpush3.msra.mxu0 %v572_v19  ;;  %931 = vmatpush3.msra.mxu1 %v604_v20 }
 0x20a   :  { %888 = vmatprep.subr.mxu0 %v587_v21  ;;  %932 = vmatprep.subr.mxu1 %v619_v22 }
 0x20b   :  { %889 = vmatpush3.msra.mxu0 %v571_v23  ;;  %933 = vmatpush3.msra.mxu1 %v603_v24 }
 0x20c   :  { %890 = vmatprep.subr.mxu0 %v586_v25  ;;  %934 = vmatprep.subr.mxu1 %v618_v26 }
 0x20d   :  { %891 = vmatpush3.msra.mxu0 %v570_v27  ;;  %935 = vmatpush3.msra.mxu1 %v602_v28 }
 0x20e   :  { %892 = vmatprep.subr.mxu0 %v585_v29  ;;  %936 = vmatprep.subr.mxu1 %v617_v30 }
 0x20f   :  { %893 = vmatpush3.msra.mxu0 %v569_v31  ;;  %937 = vmatpush3.msra.mxu1 %v601_v32 }
 0x210   :  { %894 = vmatprep.subr.mxu0 %v584_v34  ;;  %938 = vmatprep.subr.mxu1 %v616_v36 }
 0x211   :  { %895 = vmatpush3.msra.mxu0 %v568_v38  ;;  %939 = vmatpush3.msra.mxu1 %v600_v39 }
 0x212   :  { %896 = vmatprep.subr.mxu0 %v583_v40  ;;  %940 = vmatprep.subr.mxu1 %v615_v41 }
 0x213   :  { %897 = vmatpush3.msra.mxu0 %v567_v43  ;;  %941 = vmatpush3.msra.mxu1 %v599_v44 }
 0x214   :  { %898 = vmatprep.subr.mxu0 %v582_v45  ;;  %942 = vmatprep.subr.mxu1 %v614_v46 }
 0x215   :  { %899 = vmatpush3.msra.mxu0 %v566_v47  ;;  %943 = vmatpush3.msra.mxu1 %v598_v48 }
 0x216   :  { %900 = vmatprep.subr.mxu0 %v581_v49  ;;  %944 = vmatprep.subr.mxu1 %v613_v50  ;;  %v829_v50 = vld [vmem:[%s1267_s5] ss:$0 sm:$0xff]  ;;  %s1169_s5 = smov [#allocation10]  }
 0x217   :  { %901 = vmatpush3.msra.mxu0 %v565_v51  ;;  %945 = vmatpush3.msra.mxu1 %v597_v52  ;;  %s815_s20 = sshll.u32 %s1169_s5, 4  ;;  %s816_s20 = int_to_ptr.vmem [resolvable:$true] %s815_s20 }
 0x218   :  { %s1132_s21 = scalar_lea.vmem %s816_s20, 512  ;;  %p1137_p7 = scmp.lt.s32.totalorder %s816_s20, %s816_s20 }
 0x219   :  { %p1133_p6 = scmp.ne.s32.totalorder %s816_s20, %s1132_s21  ;;  %p1138_p8 = scmp.lt.s32.totalorder %s1132_s21, %s1132_s21 }
 0x21b   :  { %p1139_p9 = por %p1138_p8, %p1137_p7 }
 0x21d   :  { %p1140_p10 = pnand %p1139_p9, %p1133_p6 }
 0x2b2   :  { %v437_v62 = vpop.f32.mrf.mxu0  ;;  %v526_v63 = vpop.f32.mrf.mxu1 }
 0x2b3   :  { %v438_v0 = vadd.f32 %v437_v62, %v354_v59  ;;  %v527_v1 = vadd.f32 %v526_v63, %v362_v60 }
 0x2b4   :  { %v439_v2 = vpop.f32.mrf.mxu0  ;;  %v528_v42 = vpop.f32.mrf.mxu1 }
 0x2b5   :  { %v440_v3 = vadd.f32 %v439_v2, %v358_v33  ;;  %v529_v4 = vadd.f32 %v528_v42, %v366_v61  ;;  %v549_v37 = vmax.f32 %v438_v0, 0.0  ;;  %v551_v9 = vmax.f32 %v527_v1, 0.0 }
 0x2b6   :  { %v443_v5 = vpop.f32.mrf.mxu0  ;;  %v532_v6 = vpop.f32.mrf.mxu1 }
 0x2b7   :  { %v550_v7 = vmax.f32 %v440_v3, 0.0  ;;  %v552_v8 = vmax.f32 %v529_v4, 0.0  ;;  %v444_v10 = vadd.f32 %v443_v5, %v354_v59  ;;  %v533_v11 = vadd.f32 %v532_v6, %v362_v60 }
 0x2b8   :  { %v445_v12 = vpop.f32.mrf.mxu0  ;;  %v534_v13 = vpop.f32.mrf.mxu1 }
 0x2b9   :  { %v446_v14 = vadd.f32 %v445_v12, %v358_v33  ;;  %v535_v15 = vadd.f32 %v534_v13, %v366_v61  ;;  %700 = vmatprep.mubr.f32.mxu0 %v550_v7  ;;  %785 = vmatprep.mubr.f32.mxu1 %v552_v8  ;;  %v553_v20 = vmax.f32 %v444_v10, 0.0  ;;  %v555_v21 = vmax.f32 %v533_v11, 0.0 }
 0x2ba   :  { %v449_v16 = vpop.f32.mrf.mxu0  ;;  %v538_v17 = vpop.f32.mrf.mxu1  ;;  %701 = vmatmul.mubr.f32.vlgmr.msra.gmra.mxu0 %v549_v37  ;;  %786 = vmatmul.mubr.f32.vlgmr.msra.gmra.mxu1 %v551_v9 }
 0x2bb   :  { %v554_v18 = vmax.f32 %v446_v14, 0.0  ;;  %v556_v19 = vmax.f32 %v535_v15, 0.0  ;;  %v450_v22 = vadd.f32 %v449_v16, %v354_v59  ;;  %v539_v23 = vadd.f32 %v538_v17, %v362_v60 }
 0x2bc   :  { %v451_v24 = vpop.f32.mrf.mxu0  ;;  %v540_v25 = vpop.f32.mrf.mxu1 }
 0x2bd   :  { %v452_v26 = vadd.f32 %v451_v24, %v358_v33  ;;  %v541_v27 = vadd.f32 %v540_v25, %v366_v61  ;;  %705 = vmatprep.mubr.f32.mxu0 %v554_v18  ;;  %790 = vmatprep.mubr.f32.mxu1 %v556_v19  ;;  %v557_v32 = vmax.f32 %v450_v22, 0.0  ;;  %v559_v34 = vmax.f32 %v539_v23, 0.0 }
 0x2be   :  { %v455_v28 = vpop.f32.mrf.mxu0  ;;  %v544_v29 = vpop.f32.mrf.mxu1  ;;  %706 = vmatmul.mubr.f32.gmra.mxu0 %v553_v20  ;;  %791 = vmatmul.mubr.f32.gmra.mxu1 %v555_v21 }
 0x2bf   :  { %v558_v30 = vmax.f32 %v452_v26, 0.0  ;;  %v560_v31 = vmax.f32 %v541_v27, 0.0  ;;  %v456_v36 = vadd.f32 %v455_v28, %v354_v59  ;;  %v545_v38 = vadd.f32 %v544_v29, %v362_v60 }
 0x2c0   :  { %v457_v39 = vpop.f32.mrf.mxu0  ;;  %v546_v40 = vpop.f32.mrf.mxu1 }
 0x2c1   :  { %v458_v41 = vadd.f32 %v457_v39, %v358_v33  ;;  %v547_v43 = vadd.f32 %v546_v40, %v366_v61  ;;  %710 = vmatprep.mubr.f32.mxu0 %v558_v30  ;;  %795 = vmatprep.mubr.f32.mxu1 %v560_v31  ;;  %v561_v46 = vmax.f32 %v456_v36, 0.0  ;;  %v563_v47 = vmax.f32 %v545_v38, 0.0 }
 0x2c2   :  { %711 = vmatmul.mubr.f32.gmra.mxu0 %v557_v32  ;;  %796 = vmatmul.mubr.f32.gmra.mxu1 %v559_v34 }
 0x2c3   :  { %v562_v44 = vmax.f32 %v458_v41, 0.0  ;;  %v564_v45 = vmax.f32 %v547_v43, 0.0 }
 0x2c5   :  { %715 = vmatprep.mubr.f32.mxu0 %v562_v44  ;;  %800 = vmatprep.mubr.f32.mxu1 %v564_v45 }
 0x2c6   :  { %716 = vmatmul.mubr.f32.gmra.mxu0 %v561_v46  ;;  %801 = vmatmul.mubr.f32.gmra.mxu1 %v563_v47 }
 0x37a   :  { %v902_v48 = vpop.f32.mrf.mxu0  ;;  %v946_v49 = vpop.f32.mrf.mxu1 }
 0x37c   :  { %v903_v51 = vpop.f32.mrf.mxu0  ;;  %v947_v52 = vpop.f32.mrf.mxu1 }
 0x37d   :  { %v904_v53 = vadd.f32 %v903_v51, %v902_v48  ;;  %v948_v57 = vadd.f32 %v947_v52, %v946_v49 }
 0x37e   :  { %v905_v54 = vpop.f32.mrf.mxu0  ;;  %v949_v55 = vpop.f32.mrf.mxu1 }
 0x37f   :  { %v703_v56 = vadd.f32 %v904_v53, %v829_v50 }
 0x380   :  { %v906_v35 = vpop.f32.mrf.mxu0  ;;  %v950_v58 = vpop.f32.mrf.mxu1 }
 0x381   :  { %v788_v59 = vadd.f32 %v948_v57, %v703_v56  ;;  %v907_v60 = vadd.f32 %v906_v35, %v905_v54  ;;  %v951_v63 = vadd.f32 %v950_v58, %v949_v55 }
 0x382   :  { %v908_v33 = vpop.f32.mrf.mxu0  ;;  %v952_v61 = vpop.f32.mrf.mxu1 }
 0x383   :  { %806 = vst [vmem:[#allocation10] sm:$0xff] %v788_v59  ;;  %v708_v62 = vadd.f32 %v907_v60, %v829_v50 }
 0x384   :  { %v909_v0 = vpop.f32.mrf.mxu0  ;;  %v953_v1 = vpop.f32.mrf.mxu1 }
 0x385   :  { %v793_v2 = vadd.f32 %v951_v63, %v708_v62  ;;  %v910_v42 = vadd.f32 %v909_v0, %v908_v33  ;;  %v954_v6 = vadd.f32 %v953_v1, %v952_v61 }
 0x386   :  { %v911_v3 = vpop.f32.mrf.mxu0  ;;  %v955_v4 = vpop.f32.mrf.mxu1 }
 0x387   :  { %807 = vst [vmem:[#allocation10 + $0x8] sm:$0xff] %v793_v2  ;;  %v713_v5 = vadd.f32 %v910_v42, %v829_v50 }
 0x388   :  { %v912_v7 = vpop.f32.mrf.mxu0  ;;  %v956_v8 = vpop.f32.mrf.mxu1 }
 0x389   :  { %v798_v37 = vadd.f32 %v954_v6, %v713_v5  ;;  %v913_v9 = vadd.f32 %v912_v7, %v911_v3  ;;  %v957_v11 = vadd.f32 %v956_v8, %v955_v4 }
 0x38b   :  { %808 = vst [vmem:[#allocation10 + $0x10] sm:$0xff] %v798_v37  ;;  %v718_v10 = vadd.f32 %v913_v9, %v829_v50 }
 0x38d   :  { %v803_v12 = vadd.f32 %v957_v11, %v718_v10 }
 0x38f   :  { %809 = vst [vmem:[#allocation10 + $0x18] sm:$0xff] %v803_v12 }
 0x390   :  { %1143 = shalt.err (!%p1140_p10)
}
 0x391   :  { %821 = dma.vmem_to_hbm [thread:$0]  %s816_s20, 512, %s1268_s6, [#allocation4], %s1162_s26, %s1162_s26, %s1163_s27  }
 0x392   :  { %1158 = dma.done.wait [#allocation4], 512  }
 0x393   :  { %1159 = vsyncadd [#allocation4], 4294966784 }
 0x394   :  { %825 = vsyncpa [#allocation3], 1 }
 0x395   :  { %826 = vsyncpa [#allocation6], 1 }
 0x396   :  { %827 = vsyncpa [#allocation9], 1 }
 0x397   :  { %828 = vsyncpa [#allocation4], 1 }

</bundles_post_ra>
